<compile_context>
chip_gen: v7x
topology: tpu7x:2x2x1
jax: 0.10.0
libtpu: 0.0.40
codegen_flags: <defaults>
</compile_context>

<pallas_src>
import jax
import jax.numpy as jnp
from jax.experimental import pallas as pl
from jax.experimental.pallas import tpu as pltpu


FEATURES = 2048  # viewModule reshapes to (batch, 2048)


def _view_dma_kernel(x_hbm, o_hbm, sem):
    # Whole-array HBM->HBM DMA: no grid, no VMEM staging.
    cp = pltpu.make_async_copy(x_hbm, o_hbm, sem)
    cp.start()
    cp.wait()


def view_module_forward(x):
    """Pallas equivalent of viewModule.forward: x.view(x.shape[0], 2048)."""
    b = x.shape[0]
    flat_len = 1
    for d in x.shape[1:]:
        flat_len *= d
    assert flat_len == FEATURES, (
        f"viewModule expects {FEATURES} trailing elements per row, "
        f"got {flat_len}")

    # Contiguous row-major reshape == torch .view(): zero data movement.
    x2d = x.reshape(b, FEATURES)

    # Minimal kernel: one async copy of the whole (already lane-dense,
    # 2048 = 16*128) array. Purely HBM-bandwidth bound; no tiling, no
    # dimension_semantics, no extra buffering needed.
    return pl.pallas_call(
        _view_dma_kernel,
        out_shape=jax.ShapeDtypeStruct((b, FEATURES), x.dtype),
        in_specs=[pl.BlockSpec(memory_space=pl.ANY)],
        out_specs=pl.BlockSpec(memory_space=pl.ANY),
        scratch_shapes=[pltpu.SemaphoreType.DMA(())],
    )(x2d)


if __name__ == "__main__":
    key = jax.random.PRNGKey(0)
    # [B, C, H, W] with C*H*W == 2048, matching x.view(B, 2048).
    x = jax.random.normal(key, (2, 8, 16, 16), dtype=jnp.float32)

    out = view_module_forward(x)
    out = jax.block_until_ready(out)

    assert out.shape == (2, FEATURES), out.shape
    # Reference: plain reshape (exactly what torch .view() computes).
    ref = x.reshape(2, FEATURES)
    assert bool(jnp.array_equal(out, ref)), "kernel output != reshape reference"

    print("KERNEL_OK")
</pallas_src>

<mosaic_0001>
module attributes {stable_mosaic.version = 11 : i64} {
  func.func @_view_dma_kernel(%arg0: memref<2x2048xf32, #tpu.memory_space<any>>, %arg1: memref<2x2048xf32, #tpu.memory_space<any>>, %arg2: memref<!tpu.dma_semaphore, #tpu.memory_space<semaphore_mem>>) attributes {dimension_semantics = [], scalar_prefetch = 0 : i64, scratch_operands = 1 : i64, tpu.core_type = #tpu.core_type<tc>} {
    tpu.enqueue_dma source(%arg0 : memref<2x2048xf32, #tpu.memory_space<any>>) target(%arg1 : memref<2x2048xf32, #tpu.memory_space<any>>) target_semaphore(%arg2 : memref<!tpu.dma_semaphore, #tpu.memory_space<semaphore_mem>>)
    tpu.wait_dma2 semaphore(%arg2 : memref<!tpu.dma_semaphore, #tpu.memory_space<semaphore_mem>>) src(%arg0 : memref<2x2048xf32, #tpu.memory_space<any>>) dst(%arg1 : memref<2x2048xf32, #tpu.memory_space<any>>)
    return
  }
}

</mosaic_0001>

<bundles_post_ra>
// kernel: tpu_custom_call.1
= control target key start
LH: loop header
LB: loop body
LE: loop exit
PB: predicated region body
PF: predicated region fallthrough
CT: control target
= control target key end

     0   :  { %s35_s6 = smov [#allocation2]   ;;  %s36_s7 = smov [#allocation3]   ;;  %s54_s0 = inlined_call_operand.hbm [shape: f32[2,2048], index: 0, kind: input, shape index: {}]   ;;  %s55_s1 = inlined_call_operand.hbm [shape: f32[2,2048], index: 1, kind: output, shape index: {}]  }
   0x1   :  { %s37_s8 = smov 0  }
   0x2   :  { %18 = dma.general %s54_s0, 512, %s55_s1, %s35_s6, %s36_s7, [#allocation4], %s37_s8, 0  }
   0x3   :  { %33 = dma.done.wait [#allocation2], 512 }
   0x4   :  { %34 = vsyncadd [#allocation2], 4294966784 }
   0x5   :  { %23 = vsyncmov [#allocation2] }
   0x8   :  { %s24_s13 = vpop.sfrf %23 }
   0x9   :  { %p29_p0 = scmp.ne.s32.totalorder %s24_s13, 0 }
   0xb   :  { %28 = shalt.err (%p29_p0)  }

</bundles_post_ra>
